<compile_context>
chip_gen: v5e
topology: v5e:2x2
jax: 0.10.0
libtpu: 0.0.40
codegen_flags: <defaults>
</compile_context>

<pallas_src>
import jax
import jax.numpy as jnp
from jax.experimental import pallas as pl
from jax.experimental.pallas import tpu as pltpu

HIDDEN1 = 64
HIDDEN2 = 32


def _round_up(n, m):
    return ((n + m - 1) // m) * m


def swallow_actor_kernel(x_ref, w1_ref, b1_ref, w2_ref, b2_ref,
                         wmu_ref, bmu_ref, wsig_ref, bsig_ref,
                         mu_ref, sigma_ref):
    # layer1: Linear(input, 64) + ReLU
    h1 = jnp.dot(x_ref[...], w1_ref[...], preferred_element_type=jnp.float32)
    h1 = jnp.maximum(h1 + b1_ref[...], 0.0)

    # layer2: Linear(64, 32) + ReLU
    h2 = jnp.dot(h1, w2_ref[...], preferred_element_type=jnp.float32)
    h2 = jnp.maximum(h2 + b2_ref[...], 0.0)

    # heads: two small Linear(32, out_dim) -> write each output directly
    mu = jnp.dot(h2, wmu_ref[...], preferred_element_type=jnp.float32) + bmu_ref[...]
    sg = jnp.dot(h2, wsig_ref[...], preferred_element_type=jnp.float32) + bsig_ref[...]
    mu_ref[...] = mu.astype(mu_ref.dtype)
    sigma_ref[...] = sg.astype(sigma_ref.dtype)


def swallow_actor_forward(x, params, *, max_tb=2048):
    """Fused forward pass. x: (batch, input_dim) float32. Returns (mu, sigma)."""
    w1, b1, w2, b2, wmu, bmu, wsig, bsig = params
    batch, in_dim = x.shape
    out_dim = wmu.shape[1]

    # Batch tile: multiple of 8 sublanes (or == batch when batch <= 8).  Ensure
    # at least 2 grid steps whenever possible so megacore (v7x) shards the grid.
    if batch <= 8:
        tb = batch
    else:
        tb = min(max_tb, _round_up(batch, 8))
        if pl.cdiv(batch, tb) < 2:
            tb = _round_up(pl.cdiv(batch, 2), 8)
    grid = (pl.cdiv(batch, tb),)

    def resident(shape):
        # weights/biases: one full block, stays in VMEM across all grid steps
        return pl.BlockSpec(shape, lambda i: (0, 0))

    mu, sigma = pl.pallas_call(
        swallow_actor_kernel,
        out_shape=(jax.ShapeDtypeStruct((batch, out_dim), jnp.float32),
                   jax.ShapeDtypeStruct((batch, out_dim), jnp.float32)),
        grid=grid,
        in_specs=[
            pl.BlockSpec((tb, in_dim), lambda i: (i, 0)),   # x: tiled over batch
            resident(w1.shape), resident(b1.shape),
            resident(w2.shape), resident(b2.shape),
            resident(wmu.shape), resident(bmu.shape),
            resident(wsig.shape), resident(bsig.shape),
        ],
        out_specs=(pl.BlockSpec((tb, out_dim), lambda i: (i, 0)),
                   pl.BlockSpec((tb, out_dim), lambda i: (i, 0))),
        compiler_params=pltpu.CompilerParams(
            dimension_semantics=("parallel",),              # megacore on v7x
            vmem_limit_bytes=32 * 1024 * 1024),
    )(x, w1, b1, w2, b2, wmu, bmu, wsig, bsig)
    return mu, sigma


def init_params(key, input_dim, output_dim):
    """Deterministic synthetic parameters (shapes from SwallowActor.__init__)."""
    ks = jax.random.split(key, 8)

    def lin(kw, kb, fan_in, fan_out):
        bound = 1.0 / jnp.sqrt(fan_in)
        w = jax.random.uniform(kw, (fan_in, fan_out), jnp.float32, -bound, bound)
        b = jax.random.uniform(kb, (1, fan_out), jnp.float32, -bound, bound)
        return w, b

    w1, b1 = lin(ks[0], ks[1], input_dim, HIDDEN1)
    w2, b2 = lin(ks[2], ks[3], HIDDEN1, HIDDEN2)
    wmu, bmu = lin(ks[4], ks[5], HIDDEN2, output_dim)
    wsig, bsig = lin(ks[6], ks[7], HIDDEN2, output_dim)
    return (w1, b1, w2, b2, wmu, bmu, wsig, bsig)


def reference_forward(x, params):
    w1, b1, w2, b2, wmu, bmu, wsig, bsig = params
    h1 = jnp.maximum(x @ w1 + b1, 0.0)
    h2 = jnp.maximum(h1 @ w2 + b2, 0.0)
    return h2 @ wmu + bmu, h2 @ wsig + bsig


if __name__ == "__main__":
    key = jax.random.PRNGKey(0)
    k_p, k1, k2, k3 = jax.random.split(key, 4)

    input_dim, output_dim = 16, 4          # input_shape=(16,), output_shape=4
    params = init_params(k_p, input_dim, output_dim)

    # --- small batch, single tile: exact check -------------------------------
    x1 = jax.random.normal(k1, (8, input_dim), jnp.float32)
    mu1, sg1 = swallow_actor_forward(x1, params)
    jax.block_until_ready((mu1, sg1))
    rmu1, rsg1 = reference_forward(x1, params)
    assert mu1.shape == (8, output_dim) and sg1.shape == (8, output_dim)
    assert jnp.allclose(mu1, rmu1, atol=1e-5), "mu mismatch (batch=8)"
    assert jnp.allclose(sg1, rsg1, atol=1e-5), "sigma mismatch (batch=8)"

    # --- batch not a multiple of the tile: partial final block ---------------
    x2 = jax.random.normal(k2, (300, input_dim), jnp.float32)
    mu2, sg2 = swallow_actor_forward(x2, params, max_tb=128)   # grid=(3,)
    jax.block_until_ready((mu2, sg2))
    rmu2, rsg2 = reference_forward(x2, params)
    assert jnp.allclose(mu2, rmu2, atol=1e-5), "mu mismatch (tiled, partial block)"
    assert jnp.allclose(sg2, rsg2, atol=1e-5), "sigma mismatch (tiled, partial block)"

    # --- default tiling: >=2-grid-step cap kicks in (megacore-friendly) ------
    mu3, sg3 = swallow_actor_forward(x2, params)               # tb=152, grid=(2,)
    jax.block_until_ready((mu3, sg3))
    assert jnp.allclose(mu3, rmu2, atol=1e-5), "mu mismatch (default tiling)"
    assert jnp.allclose(sg3, rsg2, atol=1e-5), "sigma mismatch (default tiling)"

    # --- tiny batch (< 8 rows): full-dim sublane block ------------------------
    x3 = jax.random.normal(k3, (2, input_dim), jnp.float32)
    mu4, sg4 = swallow_actor_forward(x3, params)
    jax.block_until_ready((mu4, sg4))
    rmu4, rsg4 = reference_forward(x3, params)
    assert jnp.allclose(mu4, rmu4, atol=1e-5), "mu mismatch (batch=2)"
    assert jnp.allclose(sg4, rsg4, atol=1e-5), "sigma mismatch (batch=2)"

    print("KERNEL_OK")
</pallas_src>

<mosaic_0001>
module attributes {stable_mosaic.version = 11 : i64} {
  func.func @swallow_actor_kernel(%arg0: i32, %arg1: memref<8x16xf32, #tpu.memory_space<vmem>>, %arg2: memref<16x64xf32, #tpu.memory_space<vmem>>, %arg3: memref<1x64xf32, #tpu.memory_space<vmem>>, %arg4: memref<64x32xf32, #tpu.memory_space<vmem>>, %arg5: memref<1x32xf32, #tpu.memory_space<vmem>>, %arg6: memref<32x4xf32, #tpu.memory_space<vmem>>, %arg7: memref<1x4xf32, #tpu.memory_space<vmem>>, %arg8: memref<32x4xf32, #tpu.memory_space<vmem>>, %arg9: memref<1x4xf32, #tpu.memory_space<vmem>>, %arg10: memref<8x4xf32, #tpu.memory_space<vmem>>, %arg11: memref<8x4xf32, #tpu.memory_space<vmem>>) attributes {dimension_semantics = [#tpu.dimension_semantics<parallel>], iteration_bounds = array<i64: 1>, scalar_prefetch = 0 : i64, scratch_operands = 0 : i64, tpu.core_type = #tpu.core_type<tc>, window_params = [{transform_indices = @transform_0, window_bounds = array<i64: 8, 16>}, {pipeline_mode = #tpu.pipeline_mode<synchronous>, transform_indices = @transform_1, window_bounds = array<i64: 16, 64>}, {pipeline_mode = #tpu.pipeline_mode<synchronous>, transform_indices = @transform_2, window_bounds = array<i64: 1, 64>}, {pipeline_mode = #tpu.pipeline_mode<synchronous>, transform_indices = @transform_3, window_bounds = array<i64: 64, 32>}, {pipeline_mode = #tpu.pipeline_mode<synchronous>, transform_indices = @transform_4, window_bounds = array<i64: 1, 32>}, {pipeline_mode = #tpu.pipeline_mode<synchronous>, transform_indices = @transform_5, window_bounds = array<i64: 32, 4>}, {pipeline_mode = #tpu.pipeline_mode<synchronous>, transform_indices = @transform_6, window_bounds = array<i64: 1, 4>}, {pipeline_mode = #tpu.pipeline_mode<synchronous>, transform_indices = @transform_7, window_bounds = array<i64: 32, 4>}, {pipeline_mode = #tpu.pipeline_mode<synchronous>, transform_indices = @transform_8, window_bounds = array<i64: 1, 4>}, {transform_indices = @transform_9, window_bounds = array<i64: 8, 4>}, {transform_indices = @transform_10, window_bounds = array<i64: 8, 4>}]} {
    %c0 = arith.constant 0 : index
    %c0_0 = arith.constant 0 : index
    %0 = vector.load %arg1[%c0, %c0_0] : memref<8x16xf32, #tpu.memory_space<vmem>>, vector<8x16xf32>
    %c0_1 = arith.constant 0 : index
    %c0_2 = arith.constant 0 : index
    %1 = vector.load %arg2[%c0_1, %c0_2] : memref<16x64xf32, #tpu.memory_space<vmem>>, vector<16x64xf32>
    %cst = arith.constant dense<0.000000e+00> : vector<8x64xf32>
    %2 = tpu.matmul %0, %1, %cst {dimension_numbers = #tpu.dot_dimension_numbers<[1], [0], [0], [1], [0, 0, 1, 1], [], []>} : vector<8x16xf32>, vector<16x64xf32>, vector<8x64xf32> -> vector<8x64xf32>
    %c0_3 = arith.constant 0 : index
    %c0_4 = arith.constant 0 : index
    %3 = vector.load %arg3[%c0_3, %c0_4] : memref<1x64xf32, #tpu.memory_space<vmem>>, vector<1x64xf32>
    %4 = vector.broadcast %3 : vector<1x64xf32> to vector<8x64xf32>
    %5 = arith.addf %2, %4 : vector<8x64xf32>
    %cst_5 = arith.constant 0.000000e+00 : f32
    %6 = vector.broadcast %cst_5 : f32 to vector<8x64xf32>
    %7 = arith.maximumf %5, %6 : vector<8x64xf32>
    %c0_6 = arith.constant 0 : index
    %c0_7 = arith.constant 0 : index
    %8 = vector.load %arg4[%c0_6, %c0_7] : memref<64x32xf32, #tpu.memory_space<vmem>>, vector<64x32xf32>
    %cst_8 = arith.constant dense<0.000000e+00> : vector<8x32xf32>
    %9 = tpu.matmul %7, %8, %cst_8 {dimension_numbers = #tpu.dot_dimension_numbers<[1], [0], [0], [1], [0, 0, 1, 1], [], []>} : vector<8x64xf32>, vector<64x32xf32>, vector<8x32xf32> -> vector<8x32xf32>
    %c0_9 = arith.constant 0 : index
    %c0_10 = arith.constant 0 : index
    %10 = vector.load %arg5[%c0_9, %c0_10] : memref<1x32xf32, #tpu.memory_space<vmem>>, vector<1x32xf32>
    %11 = vector.broadcast %10 : vector<1x32xf32> to vector<8x32xf32>
    %12 = arith.addf %9, %11 : vector<8x32xf32>
    %cst_11 = arith.constant 0.000000e+00 : f32
    %13 = vector.broadcast %cst_11 : f32 to vector<8x32xf32>
    %14 = arith.maximumf %12, %13 : vector<8x32xf32>
    %c0_12 = arith.constant 0 : index
    %c0_13 = arith.constant 0 : index
    %15 = vector.load %arg6[%c0_12, %c0_13] : memref<32x4xf32, #tpu.memory_space<vmem>>, vector<32x4xf32>
    %cst_14 = arith.constant dense<0.000000e+00> : vector<8x4xf32>
    %16 = tpu.matmul %14, %15, %cst_14 {dimension_numbers = #tpu.dot_dimension_numbers<[1], [0], [0], [1], [0, 0, 1, 1], [], []>} : vector<8x32xf32>, vector<32x4xf32>, vector<8x4xf32> -> vector<8x4xf32>
    %c0_15 = arith.constant 0 : index
    %c0_16 = arith.constant 0 : index
    %17 = vector.load %arg7[%c0_15, %c0_16] : memref<1x4xf32, #tpu.memory_space<vmem>>, vector<1x4xf32>
    %18 = vector.broadcast %17 : vector<1x4xf32> to vector<8x4xf32>
    %19 = arith.addf %16, %18 : vector<8x4xf32>
    %c0_17 = arith.constant 0 : index
    %c0_18 = arith.constant 0 : index
    %20 = vector.load %arg8[%c0_17, %c0_18] : memref<32x4xf32, #tpu.memory_space<vmem>>, vector<32x4xf32>
    %cst_19 = arith.constant dense<0.000000e+00> : vector<8x4xf32>
    %21 = tpu.matmul %14, %20, %cst_19 {dimension_numbers = #tpu.dot_dimension_numbers<[1], [0], [0], [1], [0, 0, 1, 1], [], []>} : vector<8x32xf32>, vector<32x4xf32>, vector<8x4xf32> -> vector<8x4xf32>
    %c0_20 = arith.constant 0 : index
    %c0_21 = arith.constant 0 : index
    %22 = vector.load %arg9[%c0_20, %c0_21] : memref<1x4xf32, #tpu.memory_space<vmem>>, vector<1x4xf32>
    %23 = vector.broadcast %22 : vector<1x4xf32> to vector<8x4xf32>
    %24 = arith.addf %21, %23 : vector<8x4xf32>
    %c0_22 = arith.constant 0 : index
    %c0_23 = arith.constant 0 : index
    %25 = vector.load %arg10[%c0_22, %c0_23] : memref<8x4xf32, #tpu.memory_space<vmem>>, vector<8x4xf32>
    tpu.vector_store %arg10[%c0_22, %c0_23], %19 {strides = array<i32>} : memref<8x4xf32, #tpu.memory_space<vmem>>, vector<8x4xf32>,
    %c0_24 = arith.constant 0 : index
    %c0_25 = arith.constant 0 : index
    %26 = vector.load %arg11[%c0_24, %c0_25] : memref<8x4xf32, #tpu.memory_space<vmem>>, vector<8x4xf32>
    tpu.vector_store %arg11[%c0_24, %c0_25], %24 {strides = array<i32>} : memref<8x4xf32, #tpu.memory_space<vmem>>, vector<8x4xf32>,
    return
  }
  func.func @transform_0(%arg0: i32) -> (i32, i32) {
    %c0_i32 = arith.constant 0 : i32
    %c0_i32_0 = arith.constant 0 : i32
    return %arg0, %c0_i32 : i32, i32
  }
  func.func @transform_1(%arg0: i32) -> (i32, i32) {
    %c0_i32 = arith.constant 0 : i32
    %c0_i32_0 = arith.constant 0 : i32
    %c0_i32_1 = arith.constant 0 : i32
    return %c0_i32, %c0_i32_0 : i32, i32
  }
  func.func @transform_2(%arg0: i32) -> (i32, i32) {
    %c0_i32 = arith.constant 0 : i32
    %c0_i32_0 = arith.constant 0 : i32
    %c0_i32_1 = arith.constant 0 : i32
    return %c0_i32, %c0_i32_0 : i32, i32
  }
  func.func @transform_3(%arg0: i32) -> (i32, i32) {
    %c0_i32 = arith.constant 0 : i32
    %c0_i32_0 = arith.constant 0 : i32
    %c0_i32_1 = arith.constant 0 : i32
    return %c0_i32, %c0_i32_0 : i32, i32
  }
  func.func @transform_4(%arg0: i32) -> (i32, i32) {
    %c0_i32 = arith.constant 0 : i32
    %c0_i32_0 = arith.constant 0 : i32
    %c0_i32_1 = arith.constant 0 : i32
    return %c0_i32, %c0_i32_0 : i32, i32
  }
  func.func @transform_5(%arg0: i32) -> (i32, i32) {
    %c0_i32 = arith.constant 0 : i32
    %c0_i32_0 = arith.constant 0 : i32
    %c0_i32_1 = arith.constant 0 : i32
    return %c0_i32, %c0_i32_0 : i32, i32
  }
  func.func @transform_6(%arg0: i32) -> (i32, i32) {
    %c0_i32 = arith.constant 0 : i32
    %c0_i32_0 = arith.constant 0 : i32
    %c0_i32_1 = arith.constant 0 : i32
    return %c0_i32, %c0_i32_0 : i32, i32
  }
  func.func @transform_7(%arg0: i32) -> (i32, i32) {
    %c0_i32 = arith.constant 0 : i32
    %c0_i32_0 = arith.constant 0 : i32
    %c0_i32_1 = arith.constant 0 : i32
    return %c0_i32, %c0_i32_0 : i32, i32
  }
  func.func @transform_8(%arg0: i32) -> (i32, i32) {
    %c0_i32 = arith.constant 0 : i32
    %c0_i32_0 = arith.constant 0 : i32
    %c0_i32_1 = arith.constant 0 : i32
    return %c0_i32, %c0_i32_0 : i32, i32
  }
  func.func @transform_9(%arg0: i32) -> (i32, i32) {
    %c0_i32 = arith.constant 0 : i32
    %c0_i32_0 = arith.constant 0 : i32
    return %arg0, %c0_i32 : i32, i32
  }
  func.func @transform_10(%arg0: i32) -> (i32, i32) {
    %c0_i32 = arith.constant 0 : i32
    %c0_i32_0 = arith.constant 0 : i32
    return %arg0, %c0_i32 : i32, i32
  }
}

</mosaic_0001>

<bundles_post_ra>
// kernel: tpu_custom_call.1
= control target key start
LH: loop header
LB: loop body
LE: loop exit
PB: predicated region body
PF: predicated region fallthrough
CT: control target
= control target key end

     0   :  { %vm41_vm0 = vcmask 130048   ;;  %vm78_vm1 = vcmask 523264   ;;  %vm111_vm2 = vcmask 261120   ;;  %vm163_vm3 = vcmask 31744   ;;  %s312_s1 = inlined_call_operand.vmem [shape: f32[16,64], index: 1, kind: input, shape index: {}]   ;;  %s313_s0 = inlined_call_operand.vmem [shape: f32[8,16], index: 0, kind: input, shape index: {}]   ;;  %s314_s3 = inlined_call_operand.vmem [shape: f32[64,32], index: 3, kind: input, shape index: {}]   ;;  %s315_s2 = inlined_call_operand.vmem [shape: f32[1,64], index: 2, kind: input, shape index: {}]   ;;  %s316_s4 = inlined_call_operand.vmem [shape: f32[1,32], index: 4, kind: input, shape index: {}]   ;;  %s317_s5 = inlined_call_operand.vmem [shape: f32[32,4], index: 5, kind: input, shape index: {}]   ;;  %s318_s7 = inlined_call_operand.vmem [shape: f32[32,4], index: 7, kind: input, shape index: {}]   ;;  %s319_s6 = inlined_call_operand.vmem [shape: f32[1,4], index: 6, kind: input, shape index: {}]   ;;  %s320_s8 = inlined_call_operand.vmem [shape: f32[1,4], index: 8, kind: input, shape index: {}]   ;;  %s321_s9 = inlined_call_operand.vmem [shape: f32[8,4], index: 9, kind: output, shape index: {0}]   ;;  %s322_s10 = inlined_call_operand.vmem [shape: f32[8,4], index: 10, kind: output, shape index: {1}]  }
   0x1   :  { %v36_v0 = vld [vmem:[%s312_s1 + $0x8] sm:$0xff]  ;;  %v35_v1 = vld [vmem:[%s312_s1] sm:$0xff]  ;;  %v73_v3 = vld [vmem:[%s314_s3 + $0x38] sm:$0xff] }
   0x2   :  { %59 = vmatpush.msra.mxu0 %v36_v0  ;;  %v34_v2 = vld [vmem:[%s313_s0] sm:$0xff]  ;;  %v72_v4 = vld [vmem:[%s314_s3 + $0x30] sm:$0xff]  ;;  %90 = vmatpush.msra.mxu1 %v73_v3  ;;  %v71_v5 = vld [vmem:[%s314_s3 + $0x28] sm:$0xff] }
   0x3   :  { %v70_v6 = vld [vmem:[%s314_s3 + $0x20] sm:$0xff]  ;;  %v69_v7 = vld [vmem:[%s314_s3 + $0x18] sm:$0xff]  ;;  %v68_v8 = vld [vmem:[%s314_s3 + $0x10] sm:$0xff] }
   0x4   :  { %60 = vmatpush.msra.mxu0 %v35_v1  ;;  %91 = vmatpush.msra.mxu1 %v72_v4  ;;  %v67_v9 = vld [vmem:[%s314_s3 + $0x8] sm:$0xff]  ;;  %v66_v10 = vld [vmem:[%s314_s3] sm:$0xff]  ;;  %v106_v11 = vld [vmem:[%s317_s5 + $0x18] sm:$0xff] }
   0x5   :  { %174 = vmatmul.msk.f32.vlgmr.msra.gmra.mxu0 %vm41_vm0, %v34_v2  ;;  %v138_v12 = vld [vmem:[%s318_s7 + $0x18] sm:$0xff]  ;;  %127 = vmatpush.msra.mxu2 %v106_v11  ;;  %v178_v13 = vld [vmem:[%s315_s2] ss:$0 sm:$0xff]  ;;  %v105_v17 = vld [vmem:[%s317_s5 + $0x10] sm:$0xff] }
   0x6   :  { %92 = vmatpush.msra.mxu1 %v71_v5  ;;  %155 = vmatpush.msra.mxu3 %v138_v12  ;;  %v137_v18 = vld [vmem:[%s318_s7 + $0x10] sm:$0xff]  ;;  %v104_v19 = vld [vmem:[%s317_s5 + $0x8] sm:$0xff]  ;;  %v103_v21 = vld [vmem:[%s317_s5] sm:$0xff] }
   0x7   :  { %128 = vmatpush.msra.mxu2 %v105_v17  ;;  %v136_v20 = vld [vmem:[%s318_s7 + $0x8] sm:$0xff]  ;;  %v135_v22 = vld [vmem:[%s318_s7] sm:$0xff] }
   0x8   :  { %93 = vmatpush.msra.mxu1 %v70_v6  ;;  %156 = vmatpush.msra.mxu3 %v137_v18  ;;  %v179_v23 = vld [vmem:[%s316_s4] ss:$0 sm:$0xff] }
   0x9   :  { %129 = vmatpush.msra.mxu2 %v104_v19  ;;  %v180_v27 = vld [vmem:[%s319_s6] ss:$0 sm:$0xff] }
   0xa   :  { %94 = vmatpush.msra.mxu1 %v69_v7  ;;  %157 = vmatpush.msra.mxu3 %v136_v20  ;;  %v181_v28 = vld [vmem:[%s320_s8] ss:$0 sm:$0xff] }
   0xb   :  { %130 = vmatpush.msra.mxu2 %v103_v21 }
   0xc   :  { %95 = vmatpush.msra.mxu1 %v68_v8  ;;  %158 = vmatpush.msra.mxu3 %v135_v22 }
   0xe   :  { %96 = vmatpush.msra.mxu1 %v67_v9 }
  0x10   :  { %97 = vmatpush.msra.mxu1 %v66_v10 }
  0x82   :  { %v62_v14 = vpop.f32.mrf.mxu0 }
  0x83   :  { %v63_v15 = vadd.f32 %v178_v13, %v62_v14 }
  0x85   :  { %v65_v16 = vmax.f32 %v63_v15, 0.0 }
  0x87   :  { %175 = vmatmul.msk.f32.vlgmr.msra.gmra.mxu1 %vm78_vm1, %v65_v16 }
 0x104   :  { %v99_v24 = vpop.f32.mrf.mxu1 }
 0x105   :  { %v100_v25 = vadd.f32 %v179_v23, %v99_v24 }
 0x107   :  { %v102_v26 = vmax.f32 %v100_v25, 0.0 }
 0x109   :  { %176 = vmatmul.msk.f32.vlgmr.msra.gmra.mxu2 %vm111_vm2, %v102_v26  ;;  %177 = vmatmul.msk.f32.vlgmr.msra.gmra.mxu3 %vm111_vm2, %v102_v26 }
 0x18c   :  { %v132_v29 = vpop.f32.mrf.mxu2  ;;  %v160_v30 = vpop.f32.mrf.mxu3 }
 0x18d   :  { %v133_v31 = vadd.f32 %v180_v27, %v132_v29  ;;  %v161_v32 = vadd.f32 %v181_v28, %v160_v30 }
 0x18f   :  { %164 = vst.msk [vmem:[%s321_s9] sm:$0xff] %vm163_vm3, %v133_v31 }
 0x190   :  { %165 = vst.msk [vmem:[%s322_s10] sm:$0xff] %vm163_vm3, %v161_v32 }

</bundles_post_ra>
